<compile_context>
chip_gen: v6e
topology: v6e:2x2x1
jax: 0.10.0
libtpu: 0.0.40
codegen_flags: <defaults>
</compile_context>

<pallas_src>
import jax
import jax.numpy as jnp
from jax.experimental import pallas as pl
from jax.experimental.pallas import tpu as pltpu


def _round_up(x: int, m: int) -> int:
    return (x + m - 1) // m * m


def _vmem_budget_bytes() -> int:
    """Per-generation VMEM budget: 75% of physical per-core VMEM, capped."""
    try:
        cap = pltpu.get_tpu_info().vmem_capacity_bytes
    except Exception:
        cap = 64 * 1024 * 1024          # conservative: assume v7x-sized VMEM
    return min(int(cap) * 3 // 4, 110 * 1024 * 1024)


def _choose_tiles(B, S, H, C_pad, vmem_budget):
    """Joint (TB, TS) sizing from an explicit VMEM budget.

    Byte accounting per grid step:
      x    : 2 (double buffer) * TB*TS*H * 2 (bf16)
      mask : 2 * TB*TS * 2 (bf16)
      w    : 2 * H*C_pad * 4          (double-buffered, constant index_map)
      b    : 2 * C_pad * 4
      out  : 2 * TB*C_pad * 4
      acc  : TB*H * 4 ;  cnt : TB*128 * 4 (lane-padded scratch)
    plus ~15% slack for in-kernel f32 temporaries / compiler scratch.
    """
    B8 = _round_up(max(B, 1), 8)
    # Small batch tile keeps padding minimal (B_pad == round_up(B, 8)) and
    # guarantees >= 2 batch blocks whenever B >= 16 (v7x megacore sharding).
    TB = 16 if (B8 % 16 == 0 and B8 // 16 >= 2) else 8
    TB = min(TB, B8)
    B_pad = B8

    fixed = (2 * H * C_pad * 4 + 2 * C_pad * 4 + 2 * TB * C_pad * 4
             + TB * H * 4 + TB * 128 * 4)
    per_ts = 2 * TB * H * 2 + 2 * TB * 2
    avail = int(vmem_budget * 0.85) - fixed
    ts_cap = max(8, avail // per_ts)

    if S <= ts_cap:
        TS, S_pad = S, S                     # whole sequence in one block
    else:
        TS = 0
        # Prefer a lane-aligned divisor of S -> no sequence padding / pad copy.
        for cand in range((ts_cap // 128) * 128, 0, -128):
            if S % cand == 0:
                TS = cand
                break
        if TS == 0:
            TS = max(128, (ts_cap // 128) * 128)
        S_pad = _round_up(S, TS)
    return TB, TS, B_pad, S_pad


def _temp_scaled_classifier_kernel(x_ref, mask_ref, w_ref, b_ref, temp_ref,
                                   out_ref, acc_ref, cnt_ref):
    """Fused masked mean-pool -> linear head -> temperature scaling.

    grid = (batch_blocks, seq_blocks); seq is the last ("arbitrary") reduction axis.
      x_ref    (TB, TS, H)   bf16   embedded token tile (stays bf16; MXU eats bf16)
      mask_ref (TB, TS)      bf16   attention-mask tile (1 = token, 0 = pad)
      w_ref    (H, C_pad)    f32    head weight, zero-padded to 128 lanes
      b_ref    (1, C_pad)    f32    head bias, zero-padded
      temp_ref (1,)          f32    temperature scalar (SMEM)
      out_ref  (TB, C_pad)   f32    logits / T (revisited across the seq axis)
      acc_ref  (TB, H)       f32    VMEM scratch: running masked sum
      cnt_ref  (TB, 1)       f32    VMEM scratch: running token count
    """
    s_idx = pl.program_id(1)

    @pl.when(s_idx == 0)
    def _init():
        acc_ref[...] = jnp.zeros_like(acc_ref)
        cnt_ref[...] = jnp.zeros_like(cnt_ref)

    x = x_ref[...]                           # (TB, TS, H)  bf16
    mask = mask_ref[...]                     # (TB, TS)     bf16

    # Masked partial sum as a bf16 MXU contraction with f32 accumulation:
    #   pooled[b, h] += sum_s mask[b, s] * x[b, s, h]
    # Avoids the f32 upcast of the whole block and the mask lane->sublane
    # broadcast relayout; the multiply-reduce rides the otherwise-idle MXU.
    pooled = jnp.einsum('bqs,bsh->bqh', mask[:, None, :], x,
                        preferred_element_type=jnp.float32)       # (TB, 1, H)
    acc_ref[...] += pooled[:, 0, :]
    cnt_ref[...] += jnp.sum(mask.astype(jnp.float32), axis=1, keepdims=True)

    @pl.when(s_idx == pl.num_programs(1) - 1)
    def _finalize():
        inv_temp = 1.0 / temp_ref[0]                              # scalar (SMEM)
        # Fold mean normalization and temperature into one per-row scale:
        #   (pooled_sum @ W) / (cnt * T) + b / T == (mean-pooled @ W + b) / T
        scale = inv_temp / jnp.maximum(cnt_ref[...], 1.0)         # (TB, 1)
        logits = jnp.dot(acc_ref[...], w_ref[...],
                         preferred_element_type=jnp.float32)      # (TB, C_pad)
        out_ref[...] = logits * scale + b_ref[...] * inv_temp


def temp_scaled_forward(x_emb, attention_mask, w, b, temperature):
    """Tile and launch the fused kernel.  Returns (B, C) f32 logits / T."""
    B, S, H = x_emb.shape
    H_w, C = w.shape
    assert H_w == H
    C_pad = _round_up(C, 128)                # lane-dense (unmasked) stores

    vmem_budget = _vmem_budget_bytes()
    TB, TS, B_pad, S_pad = _choose_tiles(B, S, H, C_pad, vmem_budget)

    x_emb = x_emb.astype(jnp.bfloat16)
    mask = attention_mask.astype(jnp.bfloat16)

    # Only materialize a padded copy when strictly necessary.  Pads are zeros
    # (not uninitialized memory), so padded tokens/rows contribute nothing.
    if (B_pad, S_pad) != (B, S):
        x_p = jnp.zeros((B_pad, S_pad, H), jnp.bfloat16).at[:B, :S, :].set(x_emb)
        m_p = jnp.zeros((B_pad, S_pad), jnp.bfloat16).at[:B, :S].set(mask)
    else:
        x_p, m_p = x_emb, mask

    w_p = jnp.zeros((H, C_pad), jnp.float32).at[:, :C].set(w.astype(jnp.float32))
    b_p = jnp.zeros((1, C_pad), jnp.float32).at[:, :C].set(
        jnp.asarray(b, jnp.float32).reshape(1, C))
    t_p = jnp.asarray(temperature, jnp.float32).reshape((1,))

    grid = (B_pad // TB, S_pad // TS)

    out = pl.pallas_call(
        _temp_scaled_classifier_kernel,
        out_shape=jax.ShapeDtypeStruct((B_pad, C_pad), jnp.float32),
        grid_spec=pltpu.PrefetchScalarGridSpec(
            num_scalar_prefetch=0,
            grid=grid,
            in_specs=[
                pl.BlockSpec((TB, TS, H), lambda i, s: (i, s, 0)),   # x (bf16)
                pl.BlockSpec((TB, TS), lambda i, s: (i, s)),         # mask (bf16)
                pl.BlockSpec((H, C_pad), lambda i, s: (0, 0)),       # w
                pl.BlockSpec((1, C_pad), lambda i, s: (0, 0)),       # b
                pl.BlockSpec(memory_space=pltpu.MemorySpace.SMEM),   # temperature
            ],
            out_specs=pl.BlockSpec((TB, C_pad), lambda i, s: (i, 0)),
            scratch_shapes=[
                pltpu.VMEM((TB, H), jnp.float32),   # pooled-sum accumulator
                pltpu.VMEM((TB, 1), jnp.float32),   # token-count accumulator
            ],
        ),
        compiler_params=pltpu.CompilerParams(
            dimension_semantics=("parallel", "arbitrary"),
            vmem_limit_bytes=vmem_budget,
        ),
    )(x_p, m_p, w_p, b_p, t_p)

    return out[:B, :C]


def model_with_temperature(input_ids, token_type_ids, attention_mask, params):
    """Full forward:  logits = model(...)[0];  return logits / temperature."""
    # Embedding tables are stored in bf16 so the gather produces bf16 directly
    # (no f32 intermediate pass over the dominant (B, S, H) tensor).
    # TODO(synk): fuse this gather into the kernel (scalar-prefetch ids + DMA
    # gather from the HBM-resident table) so x_emb never round-trips via HBM.
    x_emb = (jnp.take(params["word_emb"], input_ids, axis=0)
             + jnp.take(params["type_emb"], token_type_ids, axis=0))
    return temp_scaled_forward(x_emb, attention_mask,
                               params["w"], params["b"], params["temperature"])


if __name__ == "__main__":
    # Small shapes consistent with the forward: batch=2, seq=8, hidden=32, classes=4.
    B, S, H, C, V = 2, 8, 32, 4, 64

    key = jax.random.PRNGKey(0)
    k_ids, k_we, k_te, k_w, k_b = jax.random.split(key, 5)

    input_ids = jax.random.randint(k_ids, (B, S), 0, V, dtype=jnp.int32)
    token_type_ids = jnp.zeros((B, S), dtype=jnp.int32)
    # attention mask: first token of row 1 masked out to exercise masked pooling.
    attention_mask = jnp.ones((B, S), dtype=jnp.int32).at[1, 0].set(0)

    params = {
        "word_emb": (jax.random.normal(k_we, (V, H), dtype=jnp.float32)
                     * 0.02).astype(jnp.bfloat16),
        "type_emb": (jax.random.normal(k_te, (2, H), dtype=jnp.float32)
                     * 0.02).astype(jnp.bfloat16),
        "w": jax.random.normal(k_w, (H, C), dtype=jnp.float32) * 0.1,
        "b": jax.random.normal(k_b, (1, C), dtype=jnp.float32) * 0.1,
        # nn.Parameter(torch.ones(1) * 1.5) -> temperature = 1.5
        "temperature": jnp.full((1,), 1.5, dtype=jnp.float32),
    }

    out = model_with_temperature(input_ids, token_type_ids, attention_mask, params)
    jax.block_until_ready(out)

    # Reference check in plain JAX (same bf16 embedding path, f32 math).
    x_emb_bf16 = (jnp.take(params["word_emb"], input_ids, axis=0)
                  + jnp.take(params["type_emb"], token_type_ids, axis=0))
    x32 = x_emb_bf16.astype(jnp.float32)
    mask = attention_mask.astype(jnp.float32)
    pooled = (x32 * mask[:, :, None]).sum(1) / jnp.maximum(
        mask.sum(1, keepdims=True), 1.0)
    logits_ref = pooled @ params["w"] + params["b"]
    ref = logits_ref / params["temperature"][0]

    assert out.shape == (B, C), out.shape
    assert jnp.allclose(out, ref, atol=1e-4, rtol=1e-3), (out, ref)

    print("KERNEL_OK")
</pallas_src>

<mosaic_0001>
module attributes {stable_mosaic.version = 11 : i64} {
  func.func @_temp_scaled_classifier_kernel(%arg0: i32, %arg1: i32, %arg2: memref<8x8x32xbf16, #tpu.memory_space<vmem>>, %arg3: memref<8x8xbf16, #tpu.memory_space<vmem>>, %arg4: memref<32x128xf32, #tpu.memory_space<vmem>>, %arg5: memref<1x128xf32, #tpu.memory_space<vmem>>, %arg6: memref<1xf32, #tpu.memory_space<smem>>, %arg7: memref<8x128xf32, #tpu.memory_space<vmem>>, %arg8: memref<8x32xf32, #tpu.memory_space<vmem>>, %arg9: memref<8x1xf32, #tpu.memory_space<vmem>>) attributes {dimension_semantics = [#tpu.dimension_semantics<parallel>, #tpu.dimension_semantics<arbitrary>], iteration_bounds = array<i64: 1, 1>, scalar_prefetch = 0 : i64, scratch_operands = 2 : i64, tpu.core_type = #tpu.core_type<tc>, window_params = [{transform_indices = @transform_0, window_bounds = array<i64: 8, 8, 32>}, {transform_indices = @transform_1, window_bounds = array<i64: 8, 8>}, {pipeline_mode = #tpu.pipeline_mode<synchronous>, transform_indices = @transform_2, window_bounds = array<i64: 32, 128>}, {pipeline_mode = #tpu.pipeline_mode<synchronous>, transform_indices = @transform_3, window_bounds = array<i64: 1, 128>}, {transform_indices = @transform_4, window_bounds = array<i64: 1>}, {transform_indices = @transform_5, window_bounds = array<i64: 8, 128>}]} {
    %c0_i32 = arith.constant 0 : i32
    %0 = arith.cmpi eq, %arg1, %c0_i32 : i32
    %1 = arith.extui %0 : i1 to i32
    %c0_i32_0 = arith.constant 0 : i32
    %2 = arith.cmpi ne, %1, %c0_i32_0 : i32
    scf.if %2 {
      %cst_16 = arith.constant 0.000000e+00 : f32
      %20 = vector.broadcast %cst_16 : f32 to vector<8x32xf32>
      %c0_17 = arith.constant 0 : index
      %c0_18 = arith.constant 0 : index
      %21 = vector.load %arg8[%c0_17, %c0_18] : memref<8x32xf32, #tpu.memory_space<vmem>>, vector<8x32xf32>
      tpu.vector_store %arg8[%c0_17, %c0_18], %20 {strides = array<i32>} : memref<8x32xf32, #tpu.memory_space<vmem>>, vector<8x32xf32>,
      %cst_19 = arith.constant 0.000000e+00 : f32
      %22 = vector.broadcast %cst_19 : f32 to vector<8x1xf32>
      %c0_20 = arith.constant 0 : index
      %c0_21 = arith.constant 0 : index
      %23 = vector.load %arg9[%c0_20, %c0_21] : memref<8x1xf32, #tpu.memory_space<vmem>>, vector<8x1xf32>
      tpu.vector_store %arg9[%c0_20, %c0_21], %22 {strides = array<i32>} : memref<8x1xf32, #tpu.memory_space<vmem>>, vector<8x1xf32>,
    } else {
    }
    %c0 = arith.constant 0 : index
    %c0_1 = arith.constant 0 : index
    %c0_2 = arith.constant 0 : index
    %3 = vector.load %arg2[%c0, %c0_1, %c0_2] : memref<8x8x32xbf16, #tpu.memory_space<vmem>>, vector<8x8x32xbf16>
    %c0_3 = arith.constant 0 : index
    %c0_4 = arith.constant 0 : index
    %4 = vector.load %arg3[%c0_3, %c0_4] : memref<8x8xbf16, #tpu.memory_space<vmem>>, vector<8x8xbf16>
    %5 = vector.shape_cast %4 : vector<8x8xbf16> to vector<8x1x8xbf16>
    "tpu.trace_start"() <{level = 10 : i32, message = "bqs,bsh->bqh"}> : () -> ()
    %cst = arith.constant dense<0.000000e+00> : vector<8x1x32xf32>
    %6 = tpu.matmul %5, %3, %cst {dimension_numbers = #tpu.dot_dimension_numbers<[2], [1], [1], [2], [0, 0, 0, 1, 1, 2], [0], [0]>} : vector<8x1x8xbf16>, vector<8x8x32xbf16>, vector<8x1x32xf32> -> vector<8x1x32xf32>
    "tpu.trace_stop"() : () -> ()
    %c0_5 = arith.constant 0 : index
    %c0_6 = arith.constant 0 : index
    %7 = vector.load %arg8[%c0_5, %c0_6] : memref<8x32xf32, #tpu.memory_space<vmem>>, vector<8x32xf32>
    %8 = vector.shape_cast %6 : vector<8x1x32xf32> to vector<8x32xf32>
    %9 = arith.addf %7, %8 : vector<8x32xf32>
    %c0_7 = arith.constant 0 : index
    %c0_8 = arith.constant 0 : index
    %10 = vector.load %arg8[%c0_7, %c0_8] : memref<8x32xf32, #tpu.memory_space<vmem>>, vector<8x32xf32>
    tpu.vector_store %arg8[%c0_7, %c0_8], %9 {strides = array<i32>} : memref<8x32xf32, #tpu.memory_space<vmem>>, vector<8x32xf32>,
    %c0_9 = arith.constant 0 : index
    %c0_10 = arith.constant 0 : index
    %11 = vector.load %arg9[%c0_9, %c0_10] : memref<8x1xf32, #tpu.memory_space<vmem>>, vector<8x1xf32>
    %12 = arith.extf %4 : vector<8x8xbf16> to vector<8x8xf32>
    %cst_11 = arith.constant dense<0.000000e+00> : vector<8xf32>
    %13 = vector.multi_reduction <add>, %12, %cst_11 [1] : vector<8x8xf32> to vector<8xf32>
    %14 = vector.shape_cast %13 : vector<8xf32> to vector<8x1xf32>
    %15 = arith.addf %11, %14 : vector<8x1xf32>
    %c0_12 = arith.constant 0 : index
    %c0_13 = arith.constant 0 : index
    %16 = vector.load %arg9[%c0_12, %c0_13] : memref<8x1xf32, #tpu.memory_space<vmem>>, vector<8x1xf32>
    tpu.vector_store %arg9[%c0_12, %c0_13], %15 {strides = array<i32>} : memref<8x1xf32, #tpu.memory_space<vmem>>, vector<8x1xf32>,
    %c0_i32_14 = arith.constant 0 : i32
    %17 = arith.cmpi eq, %arg1, %c0_i32_14 : i32
    %18 = arith.extui %17 : i1 to i32
    %c0_i32_15 = arith.constant 0 : i32
    %19 = arith.cmpi ne, %18, %c0_i32_15 : i32
    scf.if %19 {
      %c0_16 = arith.constant 0 : index
      %20 = memref.load %arg6[%c0_16] : memref<1xf32, #tpu.memory_space<smem>>
      %cst_17 = arith.constant 1.000000e+00 : f32
      %21 = arith.divf %cst_17, %20 : f32
      %c0_18 = arith.constant 0 : index
      %c0_19 = arith.constant 0 : index
      %22 = vector.load %arg9[%c0_18, %c0_19] : memref<8x1xf32, #tpu.memory_space<vmem>>, vector<8x1xf32>
      %cst_20 = arith.constant 1.000000e+00 : f32
      %23 = vector.broadcast %cst_20 : f32 to vector<8x1xf32>
      %24 = arith.maximumf %22, %23 : vector<8x1xf32>
      %25 = vector.broadcast %21 : f32 to vector<8x1xf32>
      %26 = arith.divf %25, %24 : vector<8x1xf32>
      %c0_21 = arith.constant 0 : index
      %c0_22 = arith.constant 0 : index
      %27 = vector.load %arg8[%c0_21, %c0_22] : memref<8x32xf32, #tpu.memory_space<vmem>>, vector<8x32xf32>
      %c0_23 = arith.constant 0 : index
      %c0_24 = arith.constant 0 : index
      %28 = vector.load %arg4[%c0_23, %c0_24] : memref<32x128xf32, #tpu.memory_space<vmem>>, vector<32x128xf32>
      %cst_25 = arith.constant dense<0.000000e+00> : vector<8x128xf32>
      %29 = tpu.matmul %27, %28, %cst_25 {dimension_numbers = #tpu.dot_dimension_numbers<[1], [0], [0], [1], [0, 0, 1, 1], [], []>} : vector<8x32xf32>, vector<32x128xf32>, vector<8x128xf32> -> vector<8x128xf32>
      %30 = vector.broadcast %26 : vector<8x1xf32> to vector<8x128xf32>
      %31 = arith.mulf %29, %30 : vector<8x128xf32>
      %c0_26 = arith.constant 0 : index
      %c0_27 = arith.constant 0 : index
      %32 = vector.load %arg5[%c0_26, %c0_27] : memref<1x128xf32, #tpu.memory_space<vmem>>, vector<1x128xf32>
      %33 = vector.broadcast %21 : f32 to vector<1x128xf32>
      %34 = arith.mulf %32, %33 : vector<1x128xf32>
      %35 = vector.broadcast %34 : vector<1x128xf32> to vector<8x128xf32>
      %36 = arith.addf %31, %35 : vector<8x128xf32>
      %c0_28 = arith.constant 0 : index
      %c0_29 = arith.constant 0 : index
      %37 = vector.load %arg7[%c0_28, %c0_29] : memref<8x128xf32, #tpu.memory_space<vmem>>, vector<8x128xf32>
      tpu.vector_store %arg7[%c0_28, %c0_29], %36 {strides = array<i32>} : memref<8x128xf32, #tpu.memory_space<vmem>>, vector<8x128xf32>,
    } else {
    }
    return
  }
  func.func @transform_0(%arg0: i32, %arg1: i32) -> (i32, i32, i32) {
    %c0_i32 = arith.constant 0 : i32
    %c0_i32_0 = arith.constant 0 : i32
    return %arg0, %arg1, %c0_i32 : i32, i32, i32
  }
  func.func @transform_1(%arg0: i32, %arg1: i32) -> (i32, i32) {
    %c0_i32 = arith.constant 0 : i32
    return %arg0, %arg1 : i32, i32
  }
  func.func @transform_2(%arg0: i32, %arg1: i32) -> (i32, i32) {
    %c0_i32 = arith.constant 0 : i32
    %c0_i32_0 = arith.constant 0 : i32
    %c0_i32_1 = arith.constant 0 : i32
    return %c0_i32, %c0_i32_0 : i32, i32
  }
  func.func @transform_3(%arg0: i32, %arg1: i32) -> (i32, i32) {
    %c0_i32 = arith.constant 0 : i32
    %c0_i32_0 = arith.constant 0 : i32
    %c0_i32_1 = arith.constant 0 : i32
    return %c0_i32, %c0_i32_0 : i32, i32
  }
  func.func @transform_4(%arg0: i32, %arg1: i32) -> i32 {
    %c0_i32 = arith.constant 0 : i32
    %c0_i32_0 = arith.constant 0 : i32
    return %c0_i32 : i32
  }
  func.func @transform_5(%arg0: i32, %arg1: i32) -> (i32, i32) {
    %c0_i32 = arith.constant 0 : i32
    %c0_i32_0 = arith.constant 0 : i32
    return %arg0, %c0_i32 : i32, i32
  }
}

</mosaic_0001>

<bundles_post_ra>
// kernel: tpu_custom_call.1
= control target key start
LH: loop header
LB: loop body
LE: loop exit
PB: predicated region body
PF: predicated region fallthrough
CT: control target
= control target key end

     0   :  { %11 = vsyncpa [#allocation6], 0  ;;  %s1010_s0 = inlined_call_operand.hbm [shape: bf16[8,8,32], index: 0, kind: input, shape index: {}]   ;;  %s1011_s1 = inlined_call_operand.hbm [shape: bf16[8,8], index: 1, kind: input, shape index: {}]   ;;  %s1012_s2 = inlined_call_operand.hbm [shape: f32[32,128], index: 2, kind: input, shape index: {}]   ;;  %s1013_s3 = inlined_call_operand.vmem [shape: f32[1,128], index: 3, kind: input, shape index: {}]   ;;  %s1014_s4 = inlined_call_operand.<no memory space> [shape: f32[1], index: 4, kind: input, shape index: {}]   ;;  %s1015_s5 = inlined_call_operand.hbm [shape: f32[8,128], index: 5, kind: output, shape index: {}]  }
   0x1   :  { %12 = vsyncpa [#allocation9], 0 }
   0x2   :  { %13 = vsyncpa [#allocation7], 0  ;;  %s884_s18 = smov [#allocation8]   ;;  %s885_s20 = smov [#allocation5]  }
   0x3   :  { %s32_s19 = sshll.u32 %s884_s18, 4  ;;  %s19_s21 = sshll.u32 %s885_s20, 4  ;;  %s33_s19 = int_to_ptr.vmem [resolvable:$true] %s32_s19  ;;  %s20_s21 = int_to_ptr.vmem [resolvable:$true] %s19_s21 }
   0x4   :  { %s806_s22 = scalar_lea.vmem %s33_s19, 64  ;;  %p811_p1 = scmp.lt.s32.totalorder %s33_s19, %s33_s19 }
   0x5   :  { %p807_p0 = scmp.ne.s32.totalorder %s33_s19, %s806_s22  ;;  %p812_p2 = scmp.lt.s32.totalorder %s806_s22, %s806_s22 }
   0x7   :  { %p813_p3 = por %p812_p2, %p811_p1 }
   0x9   :  { %p814_p4 = pnand %p813_p3, %p807_p0 }
   0xb   :  { %817 = shalt.err (!%p814_p4)
}
   0xc   :  { %35 = dma.hbm_to_vmem [thread:$0]  %s1011_s1, 64, %s33_s19, [#allocation9]  }
   0xd   :  { %s826_s25 = scalar_lea.vmem %s20_s21, 512  ;;  %p831_p6 = scmp.lt.s32.totalorder %s20_s21, %s20_s21 }
   0xe   :  { %p827_p5 = scmp.ne.s32.totalorder %s20_s21, %s826_s25  ;;  %p832_p7 = scmp.lt.s32.totalorder %s826_s25, %s826_s25 }
  0x10   :  { %p833_p8 = por %p832_p7, %p831_p6 }
  0x12   :  { %p834_p9 = pnand %p833_p8, %p827_p5 }
  0x14   :  { %837 = shalt.err (!%p834_p9)
}
  0x15   :  { %s886_s26 = smov 64   ;;  %s887_s27 = smov 4  }
  0x16   :  { %25 = dma.hbm_to_vmem [thread:$0]  %s1010_s0, 512, %s20_s21, [#allocation6], %s886_s26, %s886_s26, %s887_s27  }
  0x17   :  { %s888_s30 = smov [#allocation10]  }
  0x18   :  { %s41_s6 = sshll.u32 %s888_s30, 4  ;;  %s42_s6 = int_to_ptr.vmem [resolvable:$true] %s41_s6 }
  0x19   :  { %s846_s7 = scalar_lea.vmem %s42_s6, 512  ;;  %p851_p11 = scmp.lt.s32.totalorder %s42_s6, %s42_s6 }
  0x1a   :  { %p847_p10 = scmp.ne.s32.totalorder %s42_s6, %s846_s7  ;;  %p852_p12 = scmp.lt.s32.totalorder %s846_s7, %s846_s7 }
  0x1c   :  { %p853_p13 = por %p852_p12, %p851_p11 }
  0x1e   :  { %p854_p0 = pnand %p853_p13, %p847_p10 }
  0x20   :  { %857 = shalt.err (!%p854_p0)
}
  0x21   :  { %s889_s1 = smov 128   ;;  %s890_s8 = smov 8  }
  0x22   :  { %47 = dma.hbm_to_vmem [thread:$0]  %s1012_s2, 512, %s42_s6, [#allocation9], %s889_s1, %s889_s1, %s890_s8  }
  0x23   :  { %878 = dma.done.wait [#allocation6], 512  }
  0x24   :  { %879 = vsyncadd [#allocation6], 4294966784 }
  0x25   :  { %880 = dma.done.wait [#allocation9], 576  }
  0x26   :  { %881 = vsyncadd [#allocation9], 4294966720  ;;  %v83_v0 = vlaneseq  ;;  %v891_v1 = vmov 0.0   ;;  %vm892_vm0 = vmmov 0   ;;  %v893_v2 = vmov 1966171168  }
  0x27   :  { %720 = vmatprep.subr.bf16.mxu0 %v891_v1  ;;  %726 = vmatprep.subr.bf16.mxu1 %v891_v1  ;;  %v81_v3 = vunpack.c.l.s4 %v893_v2  ;;  %vm121_vm1 = vcmask 1043456   ;;  %v70_v7 = vld [vmem:[#allocation5] sm:$0xf]  ;;  %v71_v8 = vld [vmem:[#allocation5 + $0x4] sm:$0xf]  ;;  %vm117_vm2 = vcmask 64512   ;;  %v568_v57 = vstv %s1014_s4 }
  0x28   :  { %722 = vmatprep.mubr.msk.bf16.mxu0 %vm892_vm0, %v891_v1  ;;  %v84_v4 = vshrl.u32 %v83_v0, 7  ;;  %728 = vmatprep.mubr.msk.bf16.mxu1 %vm892_vm0, %v891_v1  ;;  %v78_v9 = vld [vmem:[#allocation8] sm:$0xf]  ;;  %v123_v10 = vsel %vm121_vm1, %v70_v7, 0  ;;  %v174_v11 = vsel %vm121_vm1, %v71_v8, 0  ;;  %vm66_vm3 = vcmask 261120  }
  0x29   :  { %v82_v5 = vunpack.c.0.s8 %v81_v3  ;;  %v557_v13 = vunpack.c.l.bf16 %v78_v9  ;;  %721 = vmatpush3.bf16.msra.mxu0 %v123_v10  ;;  %727 = vmatpush3.bf16.msra.mxu1 %v174_v11  ;;  %v72_v17 = vld [vmem:[#allocation5 + $0x8] sm:$0xf]  ;;  %v73_v22 = vld [vmem:[#allocation5 + $0xc] sm:$0xf]  ;;  %v74_v32 = vld [vmem:[#allocation5 + $0x10] sm:$0xf]  ;;  %794 = vrcp.f32 %v568_v57 }
  0x2a   :  { %v943_v16 = vsub.s32 0, %v84_v4  ;;  %732 = vmatprep.subr.bf16.mxu0 %v891_v1  ;;  %738 = vmatprep.subr.bf16.mxu1 %v891_v1  ;;  %v225_v24 = vsel %vm121_vm1, %v72_v17, 0  ;;  %v276_v28 = vsel %vm121_vm1, %v73_v22, 0  ;;  %v75_v34 = vld [vmem:[#allocation5 + $0x14] sm:$0xf]  ;;  %v327_v35 = vsel %vm121_vm1, %v74_v32, 0 }
  0x2b   :  { %v85_v6 = vsub.s32 %v82_v5, %v84_v4  ;;  %v558_v18 = vsel %vm117_vm2, %v557_v13, 0.0  ;;  %v378_v38 = vsel %vm121_vm1, %v75_v34, 0  ;;  %v76_v42 = vld [vmem:[#allocation5 + $0x18] sm:$0xf]  ;;  %v77_v44 = vld [vmem:[#allocation5 + $0x1c] sm:$0xf] }
  0x2c   :  { %559 = vadd.xlane.f32.xlu0 %v558_v18  ;;  %v429_v45 = vsel %vm121_vm1, %v76_v42, 0  ;;  %v480_v48 = vsel %vm121_vm1, %v77_v44, 0  ;;  %67 = vst.msk [vmem:[#allocation2] sm:$0xff] %vm66_vm3, %v891_v1  ;;  %v580_v53 = vld [vmem:[#allocation10 + $0x18] sm:$0xff]  ;;  %v579_v54 = vld [vmem:[#allocation10 + $0x10] sm:$0xff]  ;;  %v578_v55 = vld [vmem:[#allocation10 + $0x8] sm:$0xff] }
  0x2d   :  { %v86_v12 = vrot.slane %v78_v9, %v85_v6  ;;  %v577_v56 = vld [vmem:[#allocation10] sm:$0xff]  ;;  %vm68_vm4 = vcmask 7168   ;;  %v894_v58 = vmov 0   ;;  %vm532_vm5 = vcmask 1041409   ;;  %s895_s13 = smov [#allocation11]  }
  0x2e   :  { %69 = vst.msk [vmem:[#allocation3] sm:$0xff] %vm68_vm4, %v891_v1  ;;  %793 = vset.pattern.permute.xlu0 %v894_v58  ;;  %vm535_vm6 = vcmask 1042434   ;;  %vm538_vm7 = vcmask 1043459   ;;  %vm541_vm8 = vcmask 1044484   ;;  %vm544_vm9 = vcmask 1045509   ;;  %s676_s14 = sshll.u32 %s895_s13, 4  ;;  %s677_s14 = int_to_ptr.vmem [resolvable:$true] %s676_s14 }
  0x2f   :  { %v87_v14 = vcombine.high %v86_v12, %v86_v12  ;;  %v94_v15 = vrot.slane %v86_v12, %v85_v6  ;;  %vm547_vm10 = vcmask 1046534   ;;  %vm550_vm11 = vcmask 1047559   ;;  %s858_s15 = scalar_lea.vmem %s677_s14, 128  ;;  %p863_p2 = scmp.lt.s32.totalorder %s677_s14, %s677_s14 }
  0x30   :  { %p859_p1 = scmp.ne.s32.totalorder %s677_s14, %s858_s15  ;;  %p864_p3 = scmp.lt.s32.totalorder %s858_s15, %s858_s15 }
  0x31   :  { %v686_v19 = vpack.i.b16 %v94_v15, %v94_v15  ;;  %v105_v20 = vunpack.i.h.s16 %v94_v15  ;;  %v101_v21 = vrot.slane %v87_v14, %v85_v6  ;;  %v102_v31 = vcombine.high %v94_v15, %v94_v15 }
  0x32   :  { %p865_p4 = por %p864_p3, %p863_p2 }
  0x33   :  { %v116_v23 = vrot.slane %v686_v19, %v943_v16  ;;  %v165_v25 = vpack.i.b16 %v105_v20, %v105_v20  ;;  %v107_v26 = vunpack.i.h.s16 %v101_v21  ;;  %v689_v29 = vpack.i.b16 %v101_v21, %v101_v21 }
  0x34   :  { %v109_v37 = vunpack.i.h.s16 %v102_v31  ;;  %v692_v39 = vpack.i.b16 %v102_v31, %v102_v31  ;;  %v103_v41 = vcombine.high %v101_v21, %v101_v21  ;;  %p866_p5 = pnand %p865_p4, %p859_p1 }
  0x35   :  { %723 = vmatmul.mubr.msk.bf16.vlgmr.msra.gmra.mxu0 %vm117_vm2, %v116_v23  ;;  %v169_v27 = vrot.slane %v165_v25, %v943_v16  ;;  %v267_v30 = vpack.i.b16 %v107_v26, %v107_v26  ;;  %v220_v33 = vrot.slane %v689_v29, %v943_v16  ;;  %v556_v60 = vld [vmem:[#allocation3] sm:$0xff] }
  0x36   :  { %733 = vmatpush3.bf16.msra.mxu0 %v225_v24  ;;  %734 = vmatprep.mubr.msk.bf16.mxu0 %vm892_vm0, %v891_v1  ;;  %v369_v40 = vpack.i.b16 %v109_v37, %v109_v37  ;;  %v322_v43 = vrot.slane %v692_v39, %v943_v16  ;;  %v111_v47 = vunpack.i.h.s16 %v103_v41  ;;  %v695_v49 = vpack.i.b16 %v103_v41, %v103_v41  ;;  %v795_v59 = vpop.eup %794 }
  0x37   :  { %729 = vmatmul.mubr.msk.bf16.vlgmr.msra.gmra.mxu1 %vm117_vm2, %v169_v27  ;;  %744 = vmatprep.subr.bf16.mxu0 %v891_v1  ;;  %v271_v36 = vrot.slane %v267_v30, %v943_v16  ;;  %779 = vpush %v795_v59 }
  0x38   :  { %739 = vmatpush3.bf16.msra.mxu1 %v276_v28  ;;  %740 = vmatprep.mubr.msk.bf16.mxu1 %vm892_vm0, %v891_v1  ;;  %v373_v46 = vrot.slane %v369_v40, %v943_v16  ;;  %v471_v50 = vpack.i.b16 %v111_v47, %v111_v47  ;;  %v424_v51 = vrot.slane %v695_v49, %v943_v16 }
  0x39   :  { %750 = vmatprep.subr.bf16.mxu1 %v891_v1 }
  0x3a   :  { %v475_v52 = vrot.slane %v471_v50, %v943_v16 }
  0x3d   :  { %735 = vmatmul.mubr.msk.bf16.vlgmr.msra.gmra.mxu0 %vm117_vm2, %v220_v33 }
  0x3e   :  { %745 = vmatpush3.bf16.msra.mxu0 %v327_v35  ;;  %746 = vmatprep.mubr.msk.bf16.mxu0 %vm892_vm0, %v891_v1 }
  0x3f   :  { %741 = vmatmul.mubr.msk.bf16.vlgmr.msra.gmra.mxu1 %vm117_vm2, %v271_v36  ;;  %756 = vmatprep.subr.bf16.mxu0 %v891_v1 }
  0x40   :  { %751 = vmatpush3.bf16.msra.mxu1 %v378_v38  ;;  %752 = vmatprep.mubr.msk.bf16.mxu1 %vm892_vm0, %v891_v1 }
  0x41   :  { %762 = vmatprep.subr.bf16.mxu1 %v891_v1 }
  0x45   :  { %747 = vmatmul.mubr.msk.bf16.vlgmr.msra.gmra.mxu0 %vm117_vm2, %v322_v43 }
  0x46   :  { %757 = vmatpush3.bf16.msra.mxu0 %v429_v45  ;;  %758 = vmatprep.mubr.msk.bf16.mxu0 %vm892_vm0, %v891_v1  ;;  %v522_v45 = vld [vmem:[#allocation2] sm:$0xff] }
  0x47   :  { %753 = vmatmul.mubr.msk.bf16.vlgmr.msra.gmra.mxu1 %vm117_vm2, %v373_v46  ;;  %768 = vmatprep.subr.mxu0 %v891_v1 }
  0x48   :  { %763 = vmatpush3.bf16.msra.mxu1 %v480_v48  ;;  %764 = vmatprep.mubr.msk.bf16.mxu1 %vm892_vm0, %v891_v1 }
  0x4d   :  { %759 = vmatmul.mubr.msk.bf16.vlgmr.msra.gmra.mxu0 %vm117_vm2, %v424_v51 }
  0x4e   :  { %776 = vmatprep.mubr.msk.f32.mxu0 %vm892_vm0, %v891_v1  ;;  %769 = vmatpush3.msra.mxu0 %v580_v53 }
  0x4f   :  { %765 = vmatmul.mubr.msk.bf16.vlgmr.msra.gmra.mxu1 %vm117_vm2, %v475_v52  ;;  %770 = vmatprep.subr.mxu0 %v891_v1 }
  0x50   :  { %771 = vmatpush3.msra.mxu0 %v579_v54  ;;  %v660_v54 = vld [vmem:[%s1013_s3] sm:$0x1] }
  0x51   :  { %772 = vmatprep.subr.mxu0 %v891_v1 }
  0x52   :  { %773 = vmatpush3.msra.mxu0 %v578_v55 }
  0x53   :  { %774 = vmatprep.subr.mxu0 %v891_v1 }
  0x54   :  { %775 = vmatpush3.msra.mxu0 %v577_v56 }
  0x68   :  { %s998_s11 = spop %779 }
  0x69   :  { %v573_v3 = vstv %s998_s11 }
  0x6a   :  { %v661_v55 = vmul.f32 %v660_v54, %v573_v3 }
  0x6c   :  { %v666_v58 = vrot.slane %v661_v55, %v943_v16 }
  0xb5   :  { %v560_v61 = vpop.xlane.xlu0 %559 }
  0xb6   :  { %v561_v62 = vadd.f32 %v560_v61, %v556_v60 }
  0xb8   :  { %563 = vst.msk [vmem:[#allocation3] sm:$0xff] %vm68_vm4, %v561_v62 }
  0xbf   :  { %v571_v63 = vld [vmem:[#allocation3] sm:$0xff] }
  0xc0   :  { %v572_v0 = vmax.f32 %v571_v63, 1.0 }
  0xc2   :  { %796 = vrcp.f32 %v572_v0 }
  0xcf   :  { %v797_v2 = vpop.eup %796 }
  0xd0   :  { %v575_v4 = vmul.f32 %v797_v2, %v573_v3 }
  0xd2   :  { %656 = vperm.xlu0 %793, %v575_v4  }
  0xf5   :  { %v159_v5 = vpop.f32.mrf.mxu0 }
  0xf7   :  { %v724_v1 = vpop.f32.mrf.mxu0  ;;  %v210_v6 = vpop.f32.mrf.mxu1 }
  0xf8   :  { %v531_v18 = vrot.slane %v210_v6, 7 }
  0xf9   :  { %v162_v7 = vpop.f32.mrf.mxu0  ;;  %v730_v8 = vpop.f32.mrf.mxu1 }
  0xfa   :  { %v533_v24 = vsel %vm532_vm5, %v531_v18, %v159_v5 }
  0xfb   :  { %v725_v9 = vpop.f32.mrf.mxu0  ;;  %v213_v10 = vpop.f32.mrf.mxu1 }
  0xfd   :  { %v731_v11 = vpop.f32.mrf.mxu1  ;;  %v261_v12 = vpop.f32.mrf.mxu0 }
  0xfe   :  { %v534_v21 = vrot.slane %v261_v12, 6 }
  0xff   :  { %v736_v13 = vpop.f32.mrf.mxu0  ;;  %v312_v14 = vpop.f32.mrf.mxu1 }
 0x100   :  { %v537_v25 = vrot.slane %v312_v14, 5  ;;  %v536_v28 = vsel %vm535_vm6, %v534_v21, %v533_v24 }
 0x101   :  { %v264_v15 = vpop.f32.mrf.mxu0  ;;  %v742_v17 = vpop.f32.mrf.mxu1 }
 0x102   :  { %v539_v32 = vsel %vm538_vm7, %v537_v25, %v536_v28 }
 0x103   :  { %v737_v19 = vpop.f32.mrf.mxu0  ;;  %v315_v20 = vpop.f32.mrf.mxu1 }
 0x105   :  { %v743_v22 = vpop.f32.mrf.mxu1  ;;  %v363_v23 = vpop.f32.mrf.mxu0 }
 0x106   :  { %v540_v29 = vrot.slane %v363_v23, 4 }
 0x107   :  { %v748_v26 = vpop.f32.mrf.mxu0  ;;  %v414_v27 = vpop.f32.mrf.mxu1 }
 0x108   :  { %v543_v33 = vrot.slane %v414_v27, 3  ;;  %v542_v36 = vsel %vm541_vm8, %v540_v29, %v539_v32 }
 0x109   :  { %v366_v30 = vpop.f32.mrf.mxu0  ;;  %v754_v31 = vpop.f32.mrf.mxu1 }
 0x10a   :  { %v545_v40 = vsel %vm544_vm9, %v543_v33, %v542_v36 }
 0x10b   :  { %v749_v34 = vpop.f32.mrf.mxu0  ;;  %v417_v35 = vpop.f32.mrf.mxu1 }
 0x10d   :  { %v755_v37 = vpop.f32.mrf.mxu1  ;;  %v465_v38 = vpop.f32.mrf.mxu0 }
 0x10e   :  { %v546_v39 = vrot.slane %v465_v38, 2 }
 0x10f   :  { %v760_v41 = vpop.f32.mrf.mxu0  ;;  %v516_v42 = vpop.f32.mrf.mxu1 }
 0x110   :  { %v548_v43 = vsel %vm547_vm10, %v546_v39, %v545_v40  ;;  %v549_v44 = vrot.slane %v516_v42, 1 }
 0x111   :  { %v468_v46 = vpop.f32.mrf.mxu0  ;;  %v766_v47 = vpop.f32.mrf.mxu1 }
 0x112   :  { %v551_v48 = vsel %vm550_vm11, %v549_v44, %v548_v43 }
 0x113   :  { %v761_v49 = vpop.f32.mrf.mxu0  ;;  %v519_v50 = vpop.f32.mrf.mxu1  ;;  %v553_v51 = vadd.f32 %v551_v48, %v522_v45 }
 0x115   :  { %v767_v52 = vpop.f32.mrf.mxu1  ;;  %555 = vst.msk [vmem:[#allocation2] sm:$0xff] %vm66_vm3, %v553_v51 }
 0x11c   :  { %v576_v53 = vld [vmem:[#allocation2] sm:$0xff] }
 0x11d   :  { %777 = vmatmul.mubr.msk.f32.vlgmr.msra.gmra.mxu0 %vm66_vm3, %v576_v53 }
 0x14d   :  { %v657_v56 = vpop.permute.xlu0 %656 }
 0x1dd   :  { %v650_v57 = vpop.f32.mrf.mxu0 }
 0x1de   :  { %v659_v59 = vmul.f32 %v657_v56, %v650_v57 }
 0x1df   :  { %v778_v60 = vpop.f32.mrf.mxu0 }
 0x1e0   :  { %v668_v61 = vadd.f32 %v666_v58, %v659_v59 }
 0x1e2   :  { %669 = vst [vmem:[#allocation11] sm:$0xff] %v668_v61 }
 0x1e3   :  { %869 = shalt.err (!%p866_p5)
}
 0x1e4   :  { %679 = dma.vmem_to_hbm [thread:$0]  %s677_s14, 128, %s1015_s5, [#allocation7]  }
 0x1e5   :  { %882 = dma.done.wait [#allocation7], 128  }
 0x1e6   :  { %883 = vsyncadd [#allocation7], 4294967168 }
 0x1e7   :  { %683 = vsyncpa [#allocation6], 1 }
 0x1e8   :  { %684 = vsyncpa [#allocation9], 1 }
 0x1e9   :  { %685 = vsyncpa [#allocation7], 1 }

</bundles_post_ra>
